<compile_context>
chip_gen: v7x
topology: tpu7x:2x2x1
jax: 0.10.0
libtpu: 0.0.40
codegen_flags: <defaults>
</compile_context>

<pallas_src>
import numpy as np
import jax
import jax.numpy as jnp
from jax.experimental import pallas as pl
from jax.experimental.pallas import tpu as pltpu


def cbam_kernel(x_ref, w1t_ref, b1_ref, w2t_ref, b2_ref, k_ref, o_ref):
    """Fused CAM + SAM on one (Bt, C, HW) block.

    x_ref  : (Bt, C, HW)      input block (streaming dtype; HW lane-dense)
    w1t_ref: (C, Ch) f32      shared-MLP layer-1 weight, pre-transposed
    b1_ref : (1, Ch) f32
    w2t_ref: (Ch, C) f32      shared-MLP layer-2 weight, pre-transposed
    b2_ref : (1, C) f32
    k_ref  : (2, HW, HW) f32  banded SAM-conv matrices (taps + zero padding
                              + boundary masks folded in on the host)
    o_ref  : (Bt, C, HW)      output block (written exactly once)
    """
    c = x_ref.shape[1]
    hw = x_ref.shape[2]
    inv_hw = 1.0 / hw
    inv_c = 1.0 / c

    x = x_ref[...].astype(jnp.float32)                       # (Bt, C, HW)

    # ---------------- CAM: global max / avg pooling (full block) -------------
    pmax = jnp.max(x, axis=-1)                                # (Bt, C)
    pavg = jnp.sum(x, axis=-1) * inv_hw                       # (Bt, C)

    def mlp(v):                                               # shared MLP
        h = jnp.maximum(
            jnp.dot(v, w1t_ref[...], preferred_element_type=jnp.float32)
            + b1_ref[...], 0.0)                               # (Bt, Ch)
        return (jnp.dot(h, w2t_ref[...], preferred_element_type=jnp.float32)
                + b2_ref[...])                                # (Bt, C)

    gate = jax.nn.sigmoid(mlp(pmax) + mlp(pavg))              # (Bt, C)

    # ---------------- apply channel gate --------------------------------------
    y = x * gate[:, :, None]                                  # (Bt, C, HW)

    # -------- SAM: channel max / mean maps, 7x7 conv as MXU matmuls ----------
    cmax = jnp.max(y, axis=1)                                 # (Bt, HW)
    cavg = jnp.sum(y, axis=1) * inv_c                         # (Bt, HW)
    conv = (jnp.dot(cmax, k_ref[0], preferred_element_type=jnp.float32)
            + jnp.dot(cavg, k_ref[1], preferred_element_type=jnp.float32))

    # ---------------- apply spatial gate; single full-tile store -------------
    o_ref[...] = (y * conv[:, None, :]).astype(o_ref.dtype)


def _tpu_vmem_capacity_bytes():
    try:
        return int(pltpu.get_tpu_info().vmem_capacity_bytes)
    except Exception:
        return 64 * 1024 * 1024   # conservative fallback: v7x per-TensorCore VMEM


def _pick_batch_tile(B, f32_bytes_per_image, target_bytes, prefer_multiple_steps):
    """Largest divisor of B whose f32 working-set tile is <= target_bytes;
    optionally keep >= 2 grid steps (so both v7x TensorCores get work).
    Non-divisor B falls back gracefully (correct, just smaller tiles)."""
    cap = max(1, target_bytes // max(1, f32_bytes_per_image))
    bt = 1
    for d in range(1, B + 1):
        if B % d == 0 and d <= cap:
            bt = d
    if prefer_multiple_steps and B >= 2 and B // bt < 2:
        for d in range(bt - 1, 0, -1):
            if B % d == 0 and B // d >= 2:
                bt = d
                break
    return bt


def _build_sam_band_matrices(w_sam, H, W):
    """Fold the 7x7 (2-in -> 1-out) SAM conv taps, its zero padding and image
    boundary handling into two dense (HW, HW) banded matrices so that
    conv = cmax @ K[0] + cavg @ K[1] in the flat H*W layout."""
    w_np = np.asarray(w_sam, dtype=np.float32)                # (2, 7, 7)
    HW = H * W
    K = np.zeros((2, HW, HW), np.float32)
    ho, wo = np.meshgrid(np.arange(H), np.arange(W), indexing="ij")
    p_out = (ho * W + wo).ravel()
    for ci in range(2):
        for dy in range(7):
            for dx in range(7):
                hi = ho + dy - 3
                wi = wo + dx - 3
                valid = ((hi >= 0) & (hi < H) & (wi >= 0) & (wi < W)).ravel()
                p_in = (hi * W + wi).ravel()[valid]
                K[ci, p_in, p_out[valid]] += w_np[ci, dy, dx]
    return jnp.asarray(K)


def cbam_forward(x, w1, b1, w2, b2, w_sam, stream_dtype=None):
    """x: (B, C, H, W); w1: (C//r, C); b1: (C//r,); w2: (C, C//r); b2: (C,);
    w_sam: (2, 7, 7) (Conv2d weight with the single out-channel squeezed).
    stream_dtype: HBM streaming dtype for x/out (None -> x.dtype); compute is f32."""
    B, C, H, W = x.shape
    HW = H * W
    Ch = w1.shape[0]

    # Lane-dense layout / banded-conv applicability.
    assert C % 8 == 0 and HW % 128 == 0, "pad C to x8 / H*W to x128 for TPU"
    assert HW <= 2048, "dense banded SAM conv only for modest H*W (K is 2*HW*HW f32)"
    # TODO(synk): for large H*W, replace the dense banded matmul with a shifted
    # window conv (sublane shifts / pltpu.roll) to avoid the HW^2 K matrix.

    stream_dtype = jnp.dtype(stream_dtype if stream_dtype is not None else x.dtype)
    x3 = x.reshape(B, C, HW).astype(stream_dtype)

    w1t = jnp.asarray(w1, jnp.float32).T                      # (C, Ch)
    w2t = jnp.asarray(w2, jnp.float32).T                      # (Ch, C)
    b1r = jnp.asarray(b1, jnp.float32).reshape(1, Ch)
    b2r = jnp.asarray(b2, jnp.float32).reshape(1, C)
    ksam = _build_sam_band_matrices(w_sam, H, W)              # (2, HW, HW)

    # ------------------- generation-aware tiling & VMEM budget ----------------
    vmem_cap = _tpu_vmem_capacity_bytes()
    big_vmem = vmem_cap >= 100 * 1024 * 1024      # v5e / v6e: 128 MiB VMEM, 1 TC
    target_bytes = (12 << 20) if big_vmem else (5 << 20)      # v7x: 64 MiB, 2 TCs
    f32_per_image = C * HW * 4
    Bt = _pick_batch_tile(B, f32_per_image, target_bytes,
                          prefer_multiple_steps=not big_vmem)
    num_steps = B // Bt

    tile_stream = Bt * C * HW * stream_dtype.itemsize
    tile_f32 = Bt * f32_per_image
    resident = int(ksam.size * 4 + (C * Ch + Ch + Ch * C + C) * 4)
    # double-buffered in/out tiles + f32 temporaries (x upcast, y, pre-store) +
    # resident weights/band matrices + slack.
    need = 4 * tile_stream + 4 * tile_f32 + 2 * resident + (4 << 20)
    vmem_limit = int(min(vmem_cap - (8 << 20), max(32 << 20, need)))

    out = pl.pallas_call(
        cbam_kernel,
        out_shape=jax.ShapeDtypeStruct((B, C, HW), stream_dtype),
        grid_spec=pltpu.PrefetchScalarGridSpec(
            num_scalar_prefetch=0,
            grid=(num_steps,),
            in_specs=[
                pl.BlockSpec((Bt, C, HW), lambda b: (b, 0, 0)),     # x tile
                pl.BlockSpec((C, Ch), lambda b: (0, 0)),            # w1^T (resident)
                pl.BlockSpec((1, Ch), lambda b: (0, 0)),            # b1
                pl.BlockSpec((Ch, C), lambda b: (0, 0)),            # w2^T
                pl.BlockSpec((1, C), lambda b: (0, 0)),             # b2
                pl.BlockSpec((2, HW, HW), lambda b: (0, 0, 0)),     # SAM band mats
            ],
            out_specs=pl.BlockSpec((Bt, C, HW), lambda b: (b, 0, 0)),
        ),
        compiler_params=pltpu.CompilerParams(
            dimension_semantics=("parallel",),
            vmem_limit_bytes=vmem_limit,
        ),
    )(x3, w1t, b1r, w2t, b2r, ksam)

    return out.reshape(B, C, H, W)


def cbam_reference(x, w1, b1, w2, b2, w_sam):
    """Pure-JAX reference matching the PyTorch CBAM module (CAM then SAM)."""
    mx = jnp.max(x, axis=(2, 3))   # (B, C)
    av = jnp.mean(x, axis=(2, 3))  # (B, C)

    def mlp(v):
        return jnp.maximum(v @ w1.T + b1, 0.0) @ w2.T + b2

    gate = jax.nn.sigmoid(mlp(mx) + mlp(av))[:, :, None, None]
    y = gate * x

    cmax = jnp.max(y, axis=1, keepdims=True)
    cavg = jnp.mean(y, axis=1, keepdims=True)
    s = jnp.concatenate([cmax, cavg], axis=1)          # (B, 2, H, W)
    conv = jax.lax.conv_general_dilated(
        s, w_sam[None],                                # (1, 2, 7, 7) OIHW
        window_strides=(1, 1), padding=((3, 3), (3, 3)),
        dimension_numbers=("NCHW", "OIHW", "NCHW"),
        precision=jax.lax.Precision.HIGHEST)           # (B, 1, H, W)
    return conv * y


if __name__ == "__main__":
    B, C, H, W = 2, 32, 16, 16
    r = 4
    Ch = C // r

    key = jax.random.PRNGKey(0)
    kx, k1, k2, k3, k4, k5 = jax.random.split(key, 6)

    # Deterministic synthetic parameters (PyTorch Linear layout: (out, in)).
    x = jax.random.normal(kx, (B, C, H, W), dtype=jnp.float32)
    w1 = jax.random.normal(k1, (Ch, C), dtype=jnp.float32) * 0.1
    b1 = jax.random.normal(k2, (Ch,), dtype=jnp.float32) * 0.1
    w2 = jax.random.normal(k3, (C, Ch), dtype=jnp.float32) * 0.1
    b2 = jax.random.normal(k4, (C,), dtype=jnp.float32) * 0.1
    w_sam = jax.random.normal(k5, (2, 7, 7), dtype=jnp.float32) * 0.1

    # --- f32 streaming path (matches the PyTorch module dtype) ---
    out = jax.block_until_ready(cbam_forward(x, w1, b1, w2, b2, w_sam))
    ref = jax.block_until_ready(cbam_reference(x, w1, b1, w2, b2, w_sam))
    assert out.shape == (B, C, H, W)
    max_err = float(jnp.max(jnp.abs(out - ref)))
    assert jnp.allclose(out, ref, atol=5e-3, rtol=5e-3), max_err

    # --- bf16 streaming path (halves HBM traffic; in-kernel compute is f32) ---
    out_bf = jax.block_until_ready(
        cbam_forward(x, w1, b1, w2, b2, w_sam, stream_dtype=jnp.bfloat16))
    x_q = x.astype(jnp.bfloat16).astype(jnp.float32)
    ref_bf = jax.block_until_ready(cbam_reference(x_q, w1, b1, w2, b2, w_sam))
    max_err_bf = float(jnp.max(jnp.abs(out_bf.astype(jnp.float32) - ref_bf)))
    assert jnp.allclose(out_bf.astype(jnp.float32), ref_bf,
                        atol=5e-2, rtol=5e-2), max_err_bf

    print("KERNEL_OK")
</pallas_src>

<mosaic_0001>
module attributes {stable_mosaic.version = 11 : i64} {
  func.func @cbam_kernel(%arg0: i32, %arg1: memref<1x32x256xf32, #tpu.memory_space<vmem>>, %arg2: memref<32x8xf32, #tpu.memory_space<vmem>>, %arg3: memref<1x8xf32, #tpu.memory_space<vmem>>, %arg4: memref<8x32xf32, #tpu.memory_space<vmem>>, %arg5: memref<1x32xf32, #tpu.memory_space<vmem>>, %arg6: memref<2x256x256xf32, #tpu.memory_space<vmem>>, %arg7: memref<1x32x256xf32, #tpu.memory_space<vmem>>) attributes {dimension_semantics = [#tpu.dimension_semantics<parallel>], iteration_bounds = array<i64: 2>, scalar_prefetch = 0 : i64, scratch_operands = 0 : i64, tpu.core_type = #tpu.core_type<tc>, window_params = [{transform_indices = @transform_0, window_bounds = array<i64: 1, 32, 256>}, {pipeline_mode = #tpu.pipeline_mode<synchronous>, transform_indices = @transform_1, window_bounds = array<i64: 32, 8>}, {pipeline_mode = #tpu.pipeline_mode<synchronous>, transform_indices = @transform_2, window_bounds = array<i64: 1, 8>}, {pipeline_mode = #tpu.pipeline_mode<synchronous>, transform_indices = @transform_3, window_bounds = array<i64: 8, 32>}, {pipeline_mode = #tpu.pipeline_mode<synchronous>, transform_indices = @transform_4, window_bounds = array<i64: 1, 32>}, {pipeline_mode = #tpu.pipeline_mode<synchronous>, transform_indices = @transform_5, window_bounds = array<i64: 2, 256, 256>}, {transform_indices = @transform_6, window_bounds = array<i64: 1, 32, 256>}]} {
    %c0 = arith.constant 0 : index
    %c0_0 = arith.constant 0 : index
    %c0_1 = arith.constant 0 : index
    %0 = vector.load %arg1[%c0, %c0_0, %c0_1] : memref<1x32x256xf32, #tpu.memory_space<vmem>>, vector<1x32x256xf32>
    %cst = arith.constant dense<0xFF800000> : vector<1x32xf32>
    %1 = vector.multi_reduction <maximumf>, %0, %cst [2] : vector<1x32x256xf32> to vector<1x32xf32>
    %cst_2 = arith.constant dense<0.000000e+00> : vector<1x32xf32>
    %2 = vector.multi_reduction <add>, %0, %cst_2 [2] : vector<1x32x256xf32> to vector<1x32xf32>
    %cst_3 = arith.constant 3.906250e-03 : f32
    %3 = vector.broadcast %cst_3 : f32 to vector<1x32xf32>
    %4 = arith.mulf %2, %3 : vector<1x32xf32>
    %c0_4 = arith.constant 0 : index
    %c0_5 = arith.constant 0 : index
    %5 = vector.load %arg2[%c0_4, %c0_5] : memref<32x8xf32, #tpu.memory_space<vmem>>, vector<32x8xf32>
    %cst_6 = arith.constant dense<0.000000e+00> : vector<1x8xf32>
    %6 = tpu.matmul %1, %5, %cst_6 {dimension_numbers = #tpu.dot_dimension_numbers<[1], [0], [0], [1], [0, 0, 1, 1], [], []>} : vector<1x32xf32>, vector<32x8xf32>, vector<1x8xf32> -> vector<1x8xf32>
    %c0_7 = arith.constant 0 : index
    %c0_8 = arith.constant 0 : index
    %7 = vector.load %arg3[%c0_7, %c0_8] : memref<1x8xf32, #tpu.memory_space<vmem>>, vector<1x8xf32>
    %8 = arith.addf %6, %7 : vector<1x8xf32>
    %cst_9 = arith.constant 0.000000e+00 : f32
    %9 = vector.broadcast %cst_9 : f32 to vector<1x8xf32>
    %10 = arith.maximumf %8, %9 : vector<1x8xf32>
    %c0_10 = arith.constant 0 : index
    %c0_11 = arith.constant 0 : index
    %11 = vector.load %arg4[%c0_10, %c0_11] : memref<8x32xf32, #tpu.memory_space<vmem>>, vector<8x32xf32>
    %cst_12 = arith.constant dense<0.000000e+00> : vector<1x32xf32>
    %12 = tpu.matmul %10, %11, %cst_12 {dimension_numbers = #tpu.dot_dimension_numbers<[1], [0], [0], [1], [0, 0, 1, 1], [], []>} : vector<1x8xf32>, vector<8x32xf32>, vector<1x32xf32> -> vector<1x32xf32>
    %c0_13 = arith.constant 0 : index
    %c0_14 = arith.constant 0 : index
    %13 = vector.load %arg5[%c0_13, %c0_14] : memref<1x32xf32, #tpu.memory_space<vmem>>, vector<1x32xf32>
    %14 = arith.addf %12, %13 : vector<1x32xf32>
    %c0_15 = arith.constant 0 : index
    %c0_16 = arith.constant 0 : index
    %15 = vector.load %arg2[%c0_15, %c0_16] : memref<32x8xf32, #tpu.memory_space<vmem>>, vector<32x8xf32>
    %cst_17 = arith.constant dense<0.000000e+00> : vector<1x8xf32>
    %16 = tpu.matmul %4, %15, %cst_17 {dimension_numbers = #tpu.dot_dimension_numbers<[1], [0], [0], [1], [0, 0, 1, 1], [], []>} : vector<1x32xf32>, vector<32x8xf32>, vector<1x8xf32> -> vector<1x8xf32>
    %c0_18 = arith.constant 0 : index
    %c0_19 = arith.constant 0 : index
    %17 = vector.load %arg3[%c0_18, %c0_19] : memref<1x8xf32, #tpu.memory_space<vmem>>, vector<1x8xf32>
    %18 = arith.addf %16, %17 : vector<1x8xf32>
    %cst_20 = arith.constant 0.000000e+00 : f32
    %19 = vector.broadcast %cst_20 : f32 to vector<1x8xf32>
    %20 = arith.maximumf %18, %19 : vector<1x8xf32>
    %c0_21 = arith.constant 0 : index
    %c0_22 = arith.constant 0 : index
    %21 = vector.load %arg4[%c0_21, %c0_22] : memref<8x32xf32, #tpu.memory_space<vmem>>, vector<8x32xf32>
    %cst_23 = arith.constant dense<0.000000e+00> : vector<1x32xf32>
    %22 = tpu.matmul %20, %21, %cst_23 {dimension_numbers = #tpu.dot_dimension_numbers<[1], [0], [0], [1], [0, 0, 1, 1], [], []>} : vector<1x8xf32>, vector<8x32xf32>, vector<1x32xf32> -> vector<1x32xf32>
    %c0_24 = arith.constant 0 : index
    %c0_25 = arith.constant 0 : index
    %23 = vector.load %arg5[%c0_24, %c0_25] : memref<1x32xf32, #tpu.memory_space<vmem>>, vector<1x32xf32>
    %24 = arith.addf %22, %23 : vector<1x32xf32>
    %25 = arith.addf %14, %24 : vector<1x32xf32>
    %26 = arith.negf %25 : vector<1x32xf32>
    %27 = math.exp %26 : vector<1x32xf32>
    %cst_26 = arith.constant 1.000000e+00 : f32
    %28 = vector.broadcast %cst_26 : f32 to vector<1x32xf32>
    %29 = arith.addf %28, %27 : vector<1x32xf32>
    %30 = arith.divf %28, %29 : vector<1x32xf32>
    %31 = vector.shape_cast %30 : vector<1x32xf32> to vector<1x32x1xf32>
    %32 = vector.broadcast %31 : vector<1x32x1xf32> to vector<1x32x256xf32>
    %33 = arith.mulf %0, %32 : vector<1x32x256xf32>
    %cst_27 = arith.constant dense<0xFF800000> : vector<1x256xf32>
    %34 = vector.multi_reduction <maximumf>, %33, %cst_27 [1] : vector<1x32x256xf32> to vector<1x256xf32>
    %cst_28 = arith.constant dense<0.000000e+00> : vector<1x256xf32>
    %35 = vector.multi_reduction <add>, %33, %cst_28 [1] : vector<1x32x256xf32> to vector<1x256xf32>
    %cst_29 = arith.constant 3.125000e-02 : f32
    %36 = vector.broadcast %cst_29 : f32 to vector<1x256xf32>
    %37 = arith.mulf %35, %36 : vector<1x256xf32>
    %c0_30 = arith.constant 0 : index
    %c0_31 = arith.constant 0 : index
    %c0_32 = arith.constant 0 : index
    %38 = vector.load %arg6[%c0_30, %c0_31, %c0_32] : memref<2x256x256xf32, #tpu.memory_space<vmem>>, vector<1x256x256xf32>
    %39 = vector.shape_cast %38 : vector<1x256x256xf32> to vector<256x256xf32>
    %cst_33 = arith.constant dense<0.000000e+00> : vector<1x256xf32>
    %40 = tpu.matmul %34, %39, %cst_33 {dimension_numbers = #tpu.dot_dimension_numbers<[1], [0], [0], [1], [0, 0, 1, 1], [], []>} : vector<1x256xf32>, vector<256x256xf32>, vector<1x256xf32> -> vector<1x256xf32>
    %c1 = arith.constant 1 : index
    %c0_34 = arith.constant 0 : index
    %c0_35 = arith.constant 0 : index
    %41 = vector.load %arg6[%c1, %c0_34, %c0_35] : memref<2x256x256xf32, #tpu.memory_space<vmem>>, vector<1x256x256xf32>
    %42 = vector.shape_cast %41 : vector<1x256x256xf32> to vector<256x256xf32>
    %cst_36 = arith.constant dense<0.000000e+00> : vector<1x256xf32>
    %43 = tpu.matmul %37, %42, %cst_36 {dimension_numbers = #tpu.dot_dimension_numbers<[1], [0], [0], [1], [0, 0, 1, 1], [], []>} : vector<1x256xf32>, vector<256x256xf32>, vector<1x256xf32> -> vector<1x256xf32>
    %44 = arith.addf %40, %43 : vector<1x256xf32>
    %45 = vector.shape_cast %44 : vector<1x256xf32> to vector<1x1x256xf32>
    %46 = vector.broadcast %45 : vector<1x1x256xf32> to vector<1x32x256xf32>
    %47 = arith.mulf %33, %46 : vector<1x32x256xf32>
    %c0_37 = arith.constant 0 : index
    %c0_38 = arith.constant 0 : index
    %c0_39 = arith.constant 0 : index
    %48 = vector.load %arg7[%c0_37, %c0_38, %c0_39] : memref<1x32x256xf32, #tpu.memory_space<vmem>>, vector<1x32x256xf32>
    tpu.vector_store %arg7[%c0_37, %c0_38, %c0_39], %47 {strides = array<i32>} : memref<1x32x256xf32, #tpu.memory_space<vmem>>, vector<1x32x256xf32>,
    return
  }
  func.func @transform_0(%arg0: i32) -> (i32, i32, i32) {
    %c0_i32 = arith.constant 0 : i32
    %c0_i32_0 = arith.constant 0 : i32
    %c0_i32_1 = arith.constant 0 : i32
    return %arg0, %c0_i32, %c0_i32_0 : i32, i32, i32
  }
  func.func @transform_1(%arg0: i32) -> (i32, i32) {
    %c0_i32 = arith.constant 0 : i32
    %c0_i32_0 = arith.constant 0 : i32
    %c0_i32_1 = arith.constant 0 : i32
    return %c0_i32, %c0_i32_0 : i32, i32
  }
  func.func @transform_2(%arg0: i32) -> (i32, i32) {
    %c0_i32 = arith.constant 0 : i32
    %c0_i32_0 = arith.constant 0 : i32
    %c0_i32_1 = arith.constant 0 : i32
    return %c0_i32, %c0_i32_0 : i32, i32
  }
  func.func @transform_3(%arg0: i32) -> (i32, i32) {
    %c0_i32 = arith.constant 0 : i32
    %c0_i32_0 = arith.constant 0 : i32
    %c0_i32_1 = arith.constant 0 : i32
    return %c0_i32, %c0_i32_0 : i32, i32
  }
  func.func @transform_4(%arg0: i32) -> (i32, i32) {
    %c0_i32 = arith.constant 0 : i32
    %c0_i32_0 = arith.constant 0 : i32
    %c0_i32_1 = arith.constant 0 : i32
    return %c0_i32, %c0_i32_0 : i32, i32
  }
  func.func @transform_5(%arg0: i32) -> (i32, i32, i32) {
    %c0_i32 = arith.constant 0 : i32
    %c0_i32_0 = arith.constant 0 : i32
    %c0_i32_1 = arith.constant 0 : i32
    %c0_i32_2 = arith.constant 0 : i32
    return %c0_i32, %c0_i32_0, %c0_i32_1 : i32, i32, i32
  }
  func.func @transform_6(%arg0: i32) -> (i32, i32, i32) {
    %c0_i32 = arith.constant 0 : i32
    %c0_i32_0 = arith.constant 0 : i32
    %c0_i32_1 = arith.constant 0 : i32
    return %arg0, %c0_i32, %c0_i32_0 : i32, i32, i32
  }
}

</mosaic_0001>

<bundles_post_ra>
// kernel: tpu_custom_call.1
= control target key start
LH: loop header
LB: loop body
LE: loop exit
PB: predicated region body
PF: predicated region fallthrough
CT: control target
= control target key end

     0   :  { %11 = vsyncpa [#allocation3], 0  ;;  %s1905_s0 = inlined_call_operand.hbm [shape: f32[2,32,256], index: 0, kind: input, shape index: {}]   ;;  %s1906_s1 = inlined_call_operand.vmem [shape: f32[32,8], index: 1, kind: input, shape index: {}]   ;;  %s1907_s2 = inlined_call_operand.vmem [shape: f32[1,8], index: 2, kind: input, shape index: {}]   ;;  %s1908_s3 = inlined_call_operand.vmem [shape: f32[8,32], index: 3, kind: input, shape index: {}]   ;;  %s1909_s4 = inlined_call_operand.vmem [shape: f32[1,32], index: 4, kind: input, shape index: {}]   ;;  %s1910_s5 = inlined_call_operand.hbm [shape: f32[2,256,256], index: 5, kind: input, shape index: {}]   ;;  %s1911_s6 = inlined_call_operand.hbm [shape: f32[2,32,256], index: 6, kind: output, shape index: {}]  }
   0x1   :  { %13 = vsyncpa [#allocation3 + $0x1], 0 }
   0x2   :  { %14 = vsyncpa [#allocation6], 0 }
   0x3   :  { %15 = vsyncpa [#allocation4], 0 }
   0x4   :  { %17 = vsyncpa [#allocation4 + $0x1], 0  ;;  %s1597_s21 = smov 0   ;;  %s1599_s22 = smov 0  }
   0x5   :  { %s1601_s23 = smov 0   ;;  %s1603_s24 = smov 0  }
   0x6 LB: > { %s1618_s25 = sadd.s32 4294967295, %s1550_s24   ;;  %s1140_s26 = sadd.s32 4294967294, %s1550_s24   ;;  %s1550_s24 = sphi %s1603_s24, %s1931_s24   ;;  %s1546_s23 = sphi %s1601_s23, %s1930_s23   ;;  %s1542_s22 = sphi %s1599_s22, %s1929_s22   ;;  %s1538_s21 = sphi %s1597_s21, %s1928_s21  }
   0x7   : > { %p43_p0 = scmp.ne.s32.totalorder %s1542_s22, %s1538_s21  ;;  %p1912_p1 = scmp.eq.s32.totalorder %s1618_s25, 0 }
   0x8   : > { %p178_p3 = scmp.eq.s32.totalorder %s1140_s26, 1  ;;  %p1141_p5 = scmp.ge.s32.totalorder %s1550_s24, 1 }
   0x9   : > { %p1627_p4 = por %p1912_p1, %p43_p0  ;;  %p185_p7 = scmp.lt.s32.totalorder %s1550_s24, 3 }
   0xa   : > { %p1632_p6 = por %p178_p3, %p43_p0  ;;  %s1552_s30 = smov [#allocation5]  }
   0xb   : > { %s1915_s27 = scalar_select %p1627_p4, 1, 0 }
   0xc   : > { %s1916_s28 = scalar_select %p1632_p6, 1, 0 }
   0xd   : > { %p1637_p8 = pnand %p1141_p5, %p185_p7  ;;  %s209_s7 = sshll.u32 %s1552_s30, 4  ;;  %s1641_s7 = int_to_ptr.vmem [resolvable:$true] %s209_s7 }
   0xe   : > { %s1653_s9 = sadd.s32 1, %s1550_s24   ;;  %s30_s10 = sadd.s32 1, %s1546_s23 }
   0xf   : > { %s1917_s29 = scalar_select %p1637_p8, 1, 0 }
  0x10   : > { %p1362_p9 = pneg %p1637_p8  ;;  %s27_s11 = ssub.s32 %s1550_s24, %s1653_s9 }
  0x11   : > { %s1422_s14 = scalar_lea.hbm %s1910_s5, 16384 }
  0x12   : > { %p1648_p11 = pnand %p1362_p9, %p1912_p1  ;;  %p1423_p12 = scmp.ne.s32.totalorder %s1910_s5, %s1422_s14 }
  0x13   : > { %p1429_p5 = scmp.lt.u32.totalorder %s1422_s14, %s1910_s5 }
  0x14   : > { %p1424_p13 = pneg %p1648_p11 }
  0x16   : > { %p1425_p0 = pnand %p1424_p13, %p1423_p12 }
  0x18   : > { %p1426_p3 = pneg %p1425_p0 }
  0x1a   : > { %p1431_p7 = pnand %p1429_p5, %p1426_p3 }
  0x1c   : > { %1434 = shalt.err (!%p1431_p7)
}
  0x1d   : > { %s1435_s19 = scalar_lea.vmem %s1641_s7, 16384  ;;  %p1443_p2 = scmp.lt.s32.totalorder %s1641_s7, %s1641_s7 }
  0x1e   : > { %p1436_p9 = scmp.ne.s32.totalorder %s1641_s7, %s1435_s19  ;;  %p1444_p6 = scmp.lt.s32.totalorder %s1435_s19, %s1435_s19 }
  0x20   : > { %p1438_p10 = pnand %p1436_p9, %p1424_p13  ;;  %p1445_p4 = por %p1444_p6, %p1443_p2 }
  0x22   : > { %p1439_p1 = pneg %p1438_p10 }
  0x24   : > { %p1446_p8 = pnand %p1445_p4, %p1439_p1 }
  0x26   : > { %1449 = shalt.err (!%p1446_p8)
}
  0x27   : > { %s1553_s20 = smov 256   ;;  %s1554_s26 = smov 16  }
  0x28   : > { %1365 = dma.hbm_to_vmem [thread:$0]  (!%p1648_p11), %s1910_s5, 16384, %s1641_s7, [#allocation6], %s1553_s20, %s1553_s20, %s1554_s26  }
  0x29   : > { %p28_p1 = scmp.eq.s32.totalorder %s27_s11, 0  ;;  %p37_p2 = scmp.ne.s32.totalorder %s1546_s23, %s1542_s22 }
  0x2a   : > { %p38_p4 = scmp.eq.s32.totalorder %s1550_s24, 0  ;;  %p1375_p6 = scmp.lt.s32.totalorder %s1550_s24, 2 }
  0x2b   : > { %s1687_s13 = scalar_select %p28_p1, %s1546_s23, %s30_s10  }
  0x2c   : > { %p39_p8 = por %p38_p4, %p37_p2  ;;  %p1919_p10 = scmp.eq.s32.totalorder %s1618_s25, 1 }
  0x2d   : > { %s223_s8 = sand.u32 1, %s1546_s23   ;;  %s1161_s15 = sshll.u32 %s1550_s24, 10 }
  0x2e   : > { %p1691_p12 = por %p1919_p10, %p37_p2  ;;  %s1144_s16 = sshll.u32 %s223_s8, 6 }
  0x2f   : > { %s1700_s19 = scalar_lea.hbm %s1905_s0, %s1161_s15  ;;  %s227_s7 = scalar_lea.vmem [#allocation2], %s1144_s16 }
  0x30   : > { %s234_s10 = sshll.u32 %s227_s7, 4  ;;  %p1702_p11 = pnand %p1375_p6, %p39_p8  ;;  %s1706_s10 = int_to_ptr.vmem [resolvable:$true] %s234_s10 }
  0x31   : > { %s1708_s30 = scalar_lea.sflag [#allocation3], %s223_s8  ;;  %s1450_s12 = scalar_lea.hbm %s1700_s19, 1024 }
  0x32   : > { %p1451_p13 = scmp.ne.s32.totalorder %s1700_s19, %s1450_s12  ;;  %p1452_p0 = pneg %p1702_p11 }
  0x33   : > { %s1455_s17 = scalar_lea.hbm %s1905_s0, 2048  ;;  %p1456_p7 = scmp.lt.u32.totalorder %s1700_s19, %s1905_s0 }
  0x34   : > { %p1453_p3 = pnand %p1452_p0, %p1451_p13  ;;  %p1457_p9 = scmp.lt.u32.totalorder %s1455_s17, %s1450_s12 }
  0x35   : > { %p1459_p2 = scmp.lt.u32.totalorder %s1450_s12, %s1700_s19 }
  0x36   : > { %p1454_p5 = pneg %p1453_p3  ;;  %p1458_p1 = por %p1457_p9, %p1456_p7 }
  0x38   : > { %p1460_p4 = por %p1459_p2, %p1458_p1 }
  0x3a   : > { %p1461_p6 = pnand %p1460_p4, %p1454_p5 }
  0x3c   : > { %1464 = shalt.err (!%p1461_p6)
}
  0x3d   : > { %s1465_s8 = scalar_lea.vmem %s1706_s10, 1024  ;;  %s1555_s15 = smov [#allocation2]  }
  0x3e   : > { %p1466_p8 = scmp.ne.s32.totalorder %s1706_s10, %s1465_s8  ;;  %s1470_s16 = sshll.u32 %s1555_s15, 4  ;;  %s1471_s16 = int_to_ptr.vmem [resolvable:$false] %s1470_s16 }
  0x3f   : > { %s1472_s18 = scalar_lea.vmem %s1471_s16, 2048  ;;  %p1473_p3 = scmp.lt.s32.totalorder %s1706_s10, %s1471_s16 }
  0x40   : > { %p1468_p10 = pnand %p1466_p8, %p1452_p0  ;;  %p1474_p7 = scmp.lt.s32.totalorder %s1472_s18, %s1465_s8 }
  0x42   : > { %p1469_p13 = pneg %p1468_p10  ;;  %p1475_p9 = por %p1474_p7, %p1473_p3 }
  0x44   : > { %p1476_p1 = pnand %p1475_p9, %p1469_p13 }
  0x46   : > { %1479 = shalt.err (!%p1476_p1)
}
  0x47   : > { %1369 = dma.hbm_to_vmem [thread:$0]  (!%p1702_p11), %s1700_s19, 1024, %s1706_s10, %s1708_s30, %s1553_s20, %s1553_s20, %s1554_s26  }
  0x48   : > { %p1922_p0 = scmp.ne.s32.totalorder %s1917_s29, 0 }
  0x49   : > { %s1742_s12 = sand.u32 (!%p1922_p0), 1, %s1542_s22   ;;  %p1923_p5 = scmp.ne.s32.totalorder (!%p1922_p0), %s1915_s27, 0 }
  0x4a   : > { %246 = sbr.rel (%p1922_p0) target bundleno = 1083 (0x43b), region = 44  ;;  %s1148_s17 = sshll.u32 (!%p1922_p0), %s1742_s12, 6 }
  0x4b   : > { %s249_s7 = scalar_lea.sflag (!%p1922_p0), [#allocation3], %s1742_s12  ;;  %s252_s11 = scalar_lea.vmem (!%p1922_p0), [#allocation2], %s1148_s17 }
  0x51   : > { %1525 = dma.done.wait (%p1923_p5), %s249_s7, 1024  }
  0x52   : > { %1527 = vsyncadd (%p1923_p5), %s249_s7, 4294966272  ;;  %p1924_p11 = scmp.eq.s32.totalorder %s1618_s25, 0 }
  0x54   : > { %1529 = dma.done.wait (%p1924_p11), [#allocation6], 16384   ;;  %p1925_p2 = pmov %p1924_p11 }
  0x55   : > { %v1756_v0 = vld [vmem:[%s252_s11] sm:$0xff]  ;;  %v1758_v1 = vld [vmem:[%s252_s11 + $0x8] sm:$0xff]  ;;  %v1760_v2 = vld [vmem:[%s252_s11 + $0x10] sm:$0xff]  ;;  %v1556_v19 = vmov 0.0|0.0   ;;  %vm1557_vm0 = vmmov 0   ;;  %v1558_v23 = vmov 0.0   ;;  %v330_v24 = vlaneseq }
  0x56   : > { %1531 = vsyncadd (%p1925_p2), [#allocation6], 4294950912  ;;  %v305_v3 = vadd.f32 %v1758_v1, %v1756_v0  ;;  %v293_v4 = vmax.f32 %v1756_v0, %v1758_v1  ;;  %v1766_v5 = vld [vmem:[%s252_s11 + $0x18] sm:$0xff]  ;;  %v1772_v8 = vld [vmem:[%s252_s11 + $0x20] sm:$0xff]  ;;  %1209 = vmatprep.subr.bf16.mxu0 %v1556_v19  ;;  %1215 = vmatprep.subr.bf16.mxu1 %v1556_v19  ;;  %vm341_vm1 = vcmask 130112   ;;  %vm348_vm2 = vcmask 195712  }
  0x57   : > { %v308_v6 = vadd.f32 %v1766_v5, %v1760_v2  ;;  %v296_v7 = vmax.f32 %v1760_v2, %v1766_v5  ;;  %v1774_v9 = vld [vmem:[%s252_s11 + $0x28] sm:$0xff]  ;;  %v1780_v12 = vld [vmem:[%s252_s11 + $0x30] sm:$0xff]  ;;  %v1782_v13 = vld [vmem:[%s252_s11 + $0x38] sm:$0xff]  ;;  %1185 = vmatprep.mubr.msk.f32.mxu0 %vm1557_vm0, %v1558_v23  ;;  %1201 = vmatprep.mubr.msk.f32.mxu1 %vm1557_vm0, %v1558_v23  ;;  %v331_v25 = vand.u32 127, %v330_v24  ;;  %v1802_v30 = vshrl.u32 %v330_v24, 7  ;;  %s1162_s29 = sshll.u32 %s1618_s25, 10 }
  0x58   : > { %306 = vadd.xlane.f32.xlu1 %v305_v3  ;;  %294 = vmax.xlane.f32.xlu0 %v293_v4  ;;  %v311_v10 = vadd.f32 %v1774_v9, %v1772_v8  ;;  %v299_v11 = vmax.f32 %v1772_v8, %v1774_v9  ;;  %v314_v14 = vadd.f32 %v1782_v13, %v1780_v12  ;;  %v321_v16 = vld [vmem:[%s1906_s1] sm:$0xff]  ;;  %v322_v17 = vld [vmem:[%s1906_s1 + $0x8] sm:$0xff]  ;;  %v323_v20 = vld [vmem:[%s1906_s1 + $0x10] sm:$0xff]  ;;  %vm355_vm3 = vcmask 261312   ;;  %s284_s20 = scalar_lea.vmem [#allocation7], %s1148_s17  ;;  %s1856_s30 = scalar_lea.hbm %s1911_s6, %s1162_s29 }
  0x59   : > { %v302_v15 = vmax.f32 %v1780_v12, %v1782_v13  ;;  %v1210_v18 = vpack.c.bf16 %v322_v17, %v321_v16  ;;  %v324_v21 = vld [vmem:[%s1906_s1 + $0x18] sm:$0xff]  ;;  %v336_v28 = vadd.s32 4294967288, %v331_v25  ;;  %v343_v29 = vadd.s32 4294967280, %v331_v25  ;;  %v431_v60 = vld [vmem:[%s1908_s3] sm:$0xff]  ;;  %v749_v16 = vld [vmem:[#allocation5 + $0x8] sm:$0xff]  ;;  %s1057_s26 = sshll.u32 %s284_s20, 4  ;;  %s1858_s26 = int_to_ptr.vmem [resolvable:$true] %s1057_s26 }
  0x5a   : > { %v1213_v22 = vpack.c.bf16 %v324_v21, %v323_v20  ;;  %v350_v34 = vadd.s32 4294967272, %v331_v25  ;;  %v334_v36 = vsub.s32 %v331_v25, %v1802_v30  ;;  %vm357_vm4 = vcmask 261120   ;;  %v325_v61 = vld [vmem:[%s1907_s2] sm:$0x1]  ;;  %v815_v20 = vld [vmem:[#allocation5 + $0x210] sm:$0xff]  ;;  %v818_v25 = vld [vmem:[#allocation5 + $0x228] sm:$0xff] }
  0x5b   : > { %1211 = vmatpush3.bf16.msra.mxu0 %v1210_v18  ;;  %1217 = vmatpush3.bf16.msra.mxu1 %v1210_v18  ;;  %v339_v33 = vsub.s32 %v336_v28, %v1802_v30  ;;  %v346_v35 = vsub.s32 %v343_v29, %v1802_v30  ;;  %vm433_vm5 = vcmask 64512   ;;  %v751_v18 = vld [vmem:[#allocation5 + $0x18] sm:$0xff]  ;;  %v750_v24 = vld [vmem:[#allocation5 + $0x10] sm:$0xff]  ;;  %v753_v28 = vld [vmem:[#allocation5 + $0x28] sm:$0xff]  ;;  %s1044_s25 = scalar_lea.sflag [#allocation4], %s1742_s12  ;;  %s1480_s17 = scalar_lea.vmem %s1858_s26, 1024 }
  0x5c   : > { %309 = vadd.xlane.f32.xlu1 %v308_v6  ;;  %297 = vmax.xlane.f32.xlu0 %v296_v7  ;;  %v353_v43 = vsub.s32 %v350_v34, %v1802_v30  ;;  %v1285_v21 = vpack.c.bf16 %v751_v18, %v749_v16  ;;  %v755_v29 = vld [vmem:[#allocation5 + $0x38] sm:$0xff]  ;;  %v819_v34 = vld [vmem:[#allocation5 + $0x230] sm:$0xff]  ;;  %p1481_p4 = scmp.ne.s32.totalorder %s1858_s26, %s1480_s17  ;;  %s1559_s8 = smov [#allocation7]  }
  0x5d   : > { %1212 = vmatprep.subr.bf16.mxu0 %v1556_v19  ;;  %1218 = vmatprep.subr.bf16.mxu1 %v1556_v19  ;;  %v813_v19 = vld [vmem:[#allocation5 + $0x200] sm:$0xff]  ;;  %v766_v16 = vld [vmem:[#allocation5 + $0x90] sm:$0xff]  ;;  %v836_v18 = vld [vmem:[#allocation5 + $0x2b8] sm:$0xff]  ;;  %s1484_s15 = sshll.u32 %s1559_s8, 4  ;;  %s1485_s15 = int_to_ptr.vmem [resolvable:$false] %s1484_s15 }
  0x5e   : > { %p1482_p6 = pnand %p1481_p4, %p1691_p12  ;;  %s1486_s16 = scalar_lea.vmem %s1485_s15, 2048 }
  0x5f   : > { %1214 = vmatpush3.bf16.msra.mxu0 %v1213_v22  ;;  %1220 = vmatpush3.bf16.msra.mxu1 %v1213_v22  ;;  %v1223_v22 = vpack.c.bf16 %v815_v20, %v813_v19  ;;  %v769_v19 = vld [vmem:[#allocation5 + $0xa8] sm:$0xff]  ;;  %v771_v20 = vld [vmem:[#allocation5 + $0xb8] sm:$0xff]  ;;  %p1487_p10 = scmp.lt.s32.totalorder %s1858_s26, %s1485_s15  ;;  %p1488_p13 = scmp.lt.s32.totalorder %s1486_s16, %s1480_s17 }
  0x60   : > { %312 = vadd.xlane.f32.xlu1 %v311_v10  ;;  %300 = vmax.xlane.f32.xlu0 %v299_v11  ;;  %p1483_p8 = pneg %p1482_p6 }
  0x61   : > { %1188 = vmatprep.subr.mxu0 %v1558_v23  ;;  %1204 = vmatprep.subr.mxu1 %v1558_v23  ;;  %p1489_p3 = por %p1488_p13, %p1487_p10 }
  0x63   : > { %p1490_p7 = pnand %p1489_p3, %p1483_p8 }
  0x64   : > { %315 = vadd.xlane.f32.xlu1 %v314_v14  ;;  %303 = vmax.xlane.f32.xlu0 %v302_v15  ;;  %v814_v14 = vld [vmem:[#allocation5 + $0x208] sm:$0xff]  ;;  %v816_v15 = vld [vmem:[#allocation5 + $0x218] sm:$0xff] }
  0x65   : > { %v1221_v17 = vpack.c.bf16 %v816_v15, %v814_v14  ;;  %v764_v14 = vld [vmem:[#allocation5 + $0x80] sm:$0xff] }
  0xe5   : > { %v307_v26 = vpop.xlane.xlu1 %306  ;;  %v295_v27 = vpop.xlane.xlu0 %294 }
  0xe6   : > { %v317_v40 = vmul.f32 0.00390625, %v307_v26  ;;  %v335_v45 = vrot.slane %v295_v27, %v334_v36  ;;  %v820_v27 = vld [vmem:[#allocation5 + $0x238] sm:$0xff] }
  0xe8   : > { %v514_v50 = vrot.slane %v317_v40, %v334_v36 }
  0xe9   : > { %v310_v31 = vpop.xlane.xlu1 %309  ;;  %v298_v32 = vpop.xlane.xlu0 %297 }
  0xea   : > { %v318_v37 = vmul.f32 0.00390625, %v310_v31  ;;  %v340_v41 = vrot.slane %v298_v32, %v339_v33  ;;  %v1225_v31 = vpack.c.bf16 %v820_v27, %v818_v25  ;;  %v1289_v32 = vpack.c.bf16 %v755_v29, %v753_v28  ;;  %v835_v25 = vld [vmem:[#allocation5 + $0x2b0] sm:$0xff]  ;;  %v838_v29 = vld [vmem:[#allocation5 + $0x2c8] sm:$0xff] }
  0xeb   : > { %v1305_v27 = vpack.c.bf16 %v771_v20, %v769_v19  ;;  %v770_v28 = vld [vmem:[#allocation5 + $0xb0] sm:$0xff] }
  0xec   : > { %v518_v46 = vrot.slane %v318_v37, %v339_v33  ;;  %v342_v51 = vsel %vm341_vm1, %v340_v41, %v335_v45  ;;  %v817_v33 = vld [vmem:[#allocation5 + $0x220] sm:$0xff]  ;;  %v754_v37 = vld [vmem:[#allocation5 + $0x30] sm:$0xff] }
  0xed   : > { %v313_v38 = vpop.xlane.xlu1 %312  ;;  %v301_v39 = vpop.xlane.xlu0 %300  ;;  %v1227_v36 = vpack.c.bf16 %v819_v34, %v817_v33  ;;  %v775_v33 = vld [vmem:[#allocation5 + $0xd8] sm:$0xff] }
  0xee   : > { %v319_v42 = vmul.f32 0.00390625, %v313_v38  ;;  %v347_v44 = vrot.slane %v301_v39, %v346_v35  ;;  %v519_v55 = vsel %vm341_vm1, %v518_v46, %v514_v50  ;;  %v822_v38 = vld [vmem:[#allocation5 + $0x248] sm:$0xff]  ;;  %v824_v39 = vld [vmem:[#allocation5 + $0x258] sm:$0xff]  ;;  %v823_v46 = vld [vmem:[#allocation5 + $0x250] sm:$0xff] }
  0xef   : > { %v1229_v41 = vpack.c.bf16 %v824_v39, %v822_v38  ;;  %v826_v50 = vld [vmem:[#allocation5 + $0x268] sm:$0xff]  ;;  %v839_v38 = vld [vmem:[#allocation5 + $0x2d0] sm:$0xff]  ;;  %v772_v39 = vld [vmem:[#allocation5 + $0xc0] sm:$0xff] }
  0xf0   : > { %v523_v47 = vrot.slane %v319_v42, %v346_v35  ;;  %v349_v54 = vsel %vm348_vm2, %v347_v44, %v342_v51  ;;  %v752_v35 = vld [vmem:[#allocation5 + $0x20] sm:$0xff]  ;;  %v757_v42 = vld [vmem:[#allocation5 + $0x48] sm:$0xff]  ;;  %v828_v51 = vld [vmem:[#allocation5 + $0x278] sm:$0xff] }
  0xf1   : > { %v316_v48 = vpop.xlane.xlu1 %315  ;;  %v304_v49 = vpop.xlane.xlu0 %303  ;;  %v1291_v40 = vpack.c.bf16 %v754_v37, %v752_v35  ;;  %v821_v44 = vld [vmem:[#allocation5 + $0x240] sm:$0xff] }
  0xf2   : > { %v320_v52 = vmul.f32 0.00390625, %v316_v48  ;;  %v354_v53 = vrot.slane %v304_v49, %v353_v43  ;;  %v524_v58 = vsel %vm348_vm2, %v523_v47, %v519_v55  ;;  %v756_v47 = vld [vmem:[#allocation5 + $0x40] sm:$0xff]  ;;  %v758_v48 = vld [vmem:[#allocation5 + $0x50] sm:$0xff]  ;;  %v1231_v49 = vpack.c.bf16 %v823_v46, %v821_v44  ;;  %v763_v55 = vld [vmem:[#allocation5 + $0x78] sm:$0xff] }
  0xf3   : > { %v837_v37 = vld [vmem:[#allocation5 + $0x2c0] sm:$0xff]  ;;  %v777_v44 = vld [vmem:[#allocation5 + $0xe8] sm:$0xff] }
  0xf4   : > { %v528_v56 = vrot.slane %v320_v52, %v353_v43  ;;  %v356_v57 = vsel %vm355_vm3, %v354_v53, %v349_v54  ;;  %v759_v43 = vld [vmem:[#allocation5 + $0x58] sm:$0xff]  ;;  %v761_v52 = vld [vmem:[#allocation5 + $0x68] sm:$0xff]  ;;  %v1295_v53 = vpack.c.bf16 %v758_v48, %v756_v47  ;;  %v1233_v54 = vpack.c.bf16 %v828_v51, %v826_v50  ;;  %v843_v50 = vld [vmem:[#allocation5 + $0x2f0] sm:$0xff] }
  0xf5   : > { %1186 = vmatmul.mubr.msk.f32.vlgmr.msra.gmra.mrb[0].mxu0 %vm357_vm4, %v356_v57  ;;  %v1293_v45 = vpack.c.bf16 %v759_v43, %v757_v42  ;;  %v827_v57 = vld [vmem:[#allocation5 + $0x270] sm:$0xff]  ;;  %v842_v42 = vld [vmem:[#allocation5 + $0x2e8] sm:$0xff]  ;;  %v844_v43 = vld [vmem:[#allocation5 + $0x2f8] sm:$0xff]  ;;  %v1247_v46 = vpack.c.bf16 %v839_v38, %v837_v37 }
  0xf6   : > { %v529_v59 = vsel %vm355_vm3, %v528_v56, %v524_v58  ;;  %1190 = vmatprep.mubr.msk.f32.mxu0 %vm1557_vm0, %v1558_v23  ;;  %1189 = vmatpush3.msra.mxu0 %v431_v60  ;;  %v825_v56 = vld [vmem:[#allocation5 + $0x260] sm:$0xff]  ;;  %v1297_v58 = vpack.c.bf16 %v763_v55, %v761_v52  ;;  %v1249_v48 = vpack.c.bf16 %v844_v43, %v842_v42  ;;  %v848_v55 = vld [vmem:[#allocation5 + $0x318] sm:$0xff]  ;;  %v789_v38 = vld [vmem:[#allocation5 + $0x148] sm:$0xff] }
  0xf7   : > { %1202 = vmatmul.mubr.msk.f32.vlgmr.msra.gmra.mrb[0].mxu1 %vm357_vm4, %v529_v59  ;;  %1286 = vmatprep.subr.bf16.mxu0 %v1285_v21  ;;  %v760_v59 = vld [vmem:[#allocation5 + $0x60] sm:$0xff]  ;;  %v856_v37 = vld [vmem:[#allocation5 + $0x358] sm:$0xff]  ;;  %v855_v42 = vld [vmem:[#allocation5 + $0x350] sm:$0xff] }
  0xf8   : > { %1206 = vmatprep.mubr.msk.f32.mxu1 %vm1557_vm0, %v1558_v23  ;;  %1205 = vmatpush3.msra.mxu1 %v431_v60  ;;  %v748_v23 = vld [vmem:[#allocation5] sm:$0xff]  ;;  %v762_v60 = vld [vmem:[#allocation5 + $0x70] sm:$0xff] }
  0xf9   : > { %1222 = vmatprep.subr.bf16.mxu1 %v1221_v17  ;;  %v1287_v26 = vpack.c.bf16 %v750_v24, %v748_v23  ;;  %v834_v17 = vld [vmem:[#allocation5 + $0x2a8] sm:$0xff]  ;;  %v833_v24 = vld [vmem:[#allocation5 + $0x2a0] sm:$0xff] }
  0xfa   : > { %v1241_v23 = vpack.c.bf16 %v836_v18, %v834_v17  ;;  %v1243_v34 = vpack.c.bf16 %v835_v25, %v833_v24  ;;  %v776_v51 = vld [vmem:[#allocation5 + $0xe0] sm:$0xff] }
  0xfb   : > { %v432_v18 = vld [vmem:[%s1909_s4] sm:$0x1] }
  0xfc   : > { %v1349_v19 = vadd.f32 %v432_v18, %v432_v18  ;;  %v866_v18 = vld [vmem:[#allocation5 + $0x3a8] sm:$0xff] }
 0x1c8   : > { %v426_v62 = vpop.f32.mrb[0].mxu0 }
 0x1c9   : > { %v427_v63 = vadd.f32 %v426_v62, %v325_v61  ;;  %v1187_v3 = vpop.f32.mrb[1].mxu0  ;;  %v832_v62 = vld [vmem:[#allocation5 + $0x298] sm:$0xff] }
 0x1ca   : > { %v598_v4 = vpop.f32.mrb[0].mxu1  ;;  %v767_v3 = vld [vmem:[#allocation5 + $0x98] sm:$0xff] }
 0x1cb   : > { %v430_v6 = vmax.f32 %v427_v63, 0.0  ;;  %v599_v7 = vadd.f32 %v598_v4, %v325_v61  ;;  %v1203_v10 = vpop.f32.mrb[1].mxu1  ;;  %v830_v61 = vld [vmem:[#allocation5 + $0x288] sm:$0xff]  ;;  %v1235_v4 = vpack.c.bf16 %v827_v57, %v825_v56  ;;  %v783_v57 = vld [vmem:[#allocation5 + $0x118] sm:$0xff] }
 0x1cc   : > { %v765_v63 = vld [vmem:[#allocation5 + $0x88] sm:$0xff]  ;;  %v829_v10 = vld [vmem:[#allocation5 + $0x280] sm:$0xff] }
 0x1cd   : > { %v602_v11 = vmax.f32 %v599_v7, 0.0  ;;  %1191 = vmatmul.mubr.msk.f32.vlgmr.msra.gmra.mrb[2].mxu0 %vm433_vm5, %v430_v6  ;;  %v1299_v6 = vpack.c.bf16 %v762_v60, %v760_v59  ;;  %v1237_v7 = vpack.c.bf16 %v832_v62, %v830_v61  ;;  %v1301_v15 = vpack.c.bf16 %v767_v3, %v765_v63  ;;  %v781_v56 = vld [vmem:[#allocation5 + $0x108] sm:$0xff]  ;;  %v845_v61 = vld [vmem:[#allocation5 + $0x300] sm:$0xff]  ;;  %v847_v62 = vld [vmem:[#allocation5 + $0x310] sm:$0xff] }
 0x1ce   : > { %1288 = vmatpush1.bf16.msra.mxu0 %v1287_v26  ;;  %v768_v26 = vld [vmem:[#allocation5 + $0xa0] sm:$0xff]  ;;  %v1317_v3 = vpack.c.bf16 %v783_v57, %v781_v56 }
 0x1cf   : > { %1207 = vmatmul.mubr.msk.f32.vlgmr.msra.gmra.mrb[2].mxu1 %vm433_vm5, %v602_v11  ;;  %1290 = vmatprep.subr.bf16.mxu0 %v1289_v32  ;;  %v831_v11 = vld [vmem:[#allocation5 + $0x290] sm:$0xff]  ;;  %v773_v32 = vld [vmem:[#allocation5 + $0xc8] sm:$0xff]  ;;  %v1307_v35 = vpack.c.bf16 %v770_v28, %v768_v26  ;;  %v780_v63 = vld [vmem:[#allocation5 + $0x100] sm:$0xff] }
 0x1d0   : > { %1224 = vmatpush1.bf16.msra.mxu1 %v1223_v22  ;;  %v1239_v21 = vpack.c.bf16 %v831_v11, %v829_v10  ;;  %v1303_v22 = vpack.c.bf16 %v766_v16, %v764_v14  ;;  %v785_v10 = vld [vmem:[#allocation5 + $0x128] sm:$0xff]  ;;  %v787_v11 = vld [vmem:[#allocation5 + $0x138] sm:$0xff]  ;;  %v1255_v14 = vpack.c.bf16 %v847_v62, %v845_v61  ;;  %v849_v28 = vld [vmem:[#allocation5 + $0x320] sm:$0xff] }
 0x1d1   : > { %1226 = vmatprep.subr.bf16.mxu1 %v1225_v31  ;;  %v840_v31 = vld [vmem:[#allocation5 + $0x2d8] sm:$0xff]  ;;  %v1321_v17 = vpack.c.bf16 %v787_v11, %v785_v10  ;;  %v792_v57 = vld [vmem:[#allocation5 + $0x160] sm:$0xff]  ;;  %v862_v61 = vld [vmem:[#allocation5 + $0x388] sm:$0xff] }
 0x1d2   : > { %1292 = vmatpush1.bf16.msra.mxu0 %v1291_v40  ;;  %v1309_v40 = vpack.c.bf16 %v775_v33, %v773_v32  ;;  %v864_v62 = vld [vmem:[#allocation5 + $0x398] sm:$0xff] }
 0x1d3   : > { %1294 = vmatprep.subr.bf16.mxu0 %v1293_v45  ;;  %v779_v45 = vld [vmem:[#allocation5 + $0xf8] sm:$0xff] }
 0x1d4   : > { %1228 = vmatpush1.bf16.msra.mxu1 %v1227_v36  ;;  %v1245_v36 = vpack.c.bf16 %v840_v31, %v838_v29  ;;  %v1313_v52 = vpack.c.bf16 %v779_v45, %v777_v44  ;;  %v851_v29 = vld [vmem:[#allocation5 + $0x330] sm:$0xff]  ;;  %v784_v31 = vld [vmem:[#allocation5 + $0x120] sm:$0xff] }
 0x1d5   : > { %1230 = vmatprep.subr.bf16.mxu1 %v1229_v41  ;;  %v774_v41 = vld [vmem:[#allocation5 + $0xd0] sm:$0xff]  ;;  %v1259_v33 = vpack.c.bf16 %v851_v29, %v849_v28  ;;  %v788_v45 = vld [vmem:[#allocation5 + $0x140] sm:$0xff] }
 0x1d6   : > { %1296 = vmatpush1.bf16.msra.mxu0 %v1295_v53  ;;  %v1311_v47 = vpack.c.bf16 %v774_v41, %v772_v39  ;;  %v778_v53 = vld [vmem:[#allocation5 + $0xf0] sm:$0xff]  ;;  %v853_v41 = vld [vmem:[#allocation5 + $0x340] sm:$0xff] }
 0x1d7   : > { %1298 = vmatprep.subr.bf16.mxu0 %v1297_v58  ;;  %v1315_v59 = vpack.c.bf16 %v778_v53, %v776_v51  ;;  %v1263_v44 = vpack.c.bf16 %v855_v42, %v853_v41  ;;  %v857_v53 = vld [vmem:[#allocation5 + $0x360] sm:$0xff]  ;;  %v802_v28 = vld [vmem:[#allocation5 + $0x1b0] sm:$0xff]  ;;  %v874_v42 = vld [vmem:[#allocation5 + $0x3e8] sm:$0xff] }
 0x1d8   : > { %1232 = vmatpush1.bf16.msra.mxu1 %v1231_v49  ;;  %v841_v49 = vld [vmem:[#allocation5 + $0x2e0] sm:$0xff]  ;;  %v806_v41 = vld [vmem:[#allocation5 + $0x1d0] sm:$0xff] }
 0x1d9   : > { %1234 = vmatprep.subr.bf16.mxu1 %v1233_v54  ;;  %v846_v54 = vld [vmem:[#allocation5 + $0x308] sm:$0xff]  ;;  %v1251_v58 = vpack.c.bf16 %v843_v50, %v841_v49  ;;  %v860_v49 = vld [vmem:[#allocation5 + $0x378] sm:$0xff] }
 0x1da   : > { %1300 = vmatpush1.bf16.msra.mxu0 %v1299_v6  ;;  %v1253_v60 = vpack.c.bf16 %v848_v55, %v846_v54  ;;  %v850_v6 = vld [vmem:[#allocation5 + $0x328] sm:$0xff]  ;;  %v859_v54 = vld [vmem:[#allocation5 + $0x370] sm:$0xff] }
 0x1db   : > { %1302 = vmatprep.subr.bf16.mxu0 %v1301_v15  ;;  %v793_v50 = vld [vmem:[#allocation5 + $0x168] sm:$0xff]  ;;  %v1267_v56 = vpack.c.bf16 %v859_v54, %v857_v53  ;;  %v810_v53 = vld [vmem:[#allocation5 + $0x1f0] sm:$0xff] }
 0x1dc   : > { %1236 = vmatpush1.bf16.msra.mxu1 %v1235_v4  ;;  %v782_v4 = vld [vmem:[#allocation5 + $0x110] sm:$0xff] }
 0x1dd   : > { %1238 = vmatprep.subr.bf16.mxu1 %v1237_v7  ;;  %v852_v7 = vld [vmem:[#allocation5 + $0x338] sm:$0xff]  ;;  %v1319_v15 = vpack.c.bf16 %v782_v4, %v780_v63  ;;  %v797_v63 = vld [vmem:[#allocation5 + $0x188] sm:$0xff] }
 0x1de   : > { %1304 = vmatpush1.bf16.msra.mxu0 %v1303_v22  ;;  %v1257_v16 = vpack.c.bf16 %v852_v7, %v850_v6  ;;  %v799_v4 = vld [vmem:[#allocation5 + $0x198] sm:$0xff]  ;;  %v861_v6 = vld [vmem:[#allocation5 + $0x380] sm:$0xff]  ;;  %v863_v7 = vld [vmem:[#allocation5 + $0x390] sm:$0xff] }
 0x1df   : > { %1306 = vmatprep.subr.bf16.mxu0 %v1305_v27  ;;  %v1333_v11 = vpack.c.bf16 %v799_v4, %v797_v63 }
 0x1e0   : > { %1240 = vmatpush1.bf16.msra.mxu1 %v1239_v21 }
 0x1e1   : > { %1242 = vmatprep.subr.bf16.mxu1 %v1241_v23 }
 0x1e2   : > { %1308 = vmatpush1.bf16.msra.mxu0 %v1307_v35 }
 0x1e3   : > { %1310 = vmatprep.subr.bf16.mxu0 %v1309_v40  ;;  %v791_v40 = vld [vmem:[#allocation5 + $0x158] sm:$0xff] }
 0x1e4   : > { %1244 = vmatpush1.bf16.msra.mxu1 %v1243_v34  ;;  %v786_v34 = vld [vmem:[#allocation5 + $0x130] sm:$0xff]  ;;  %v1325_v43 = vpack.c.bf16 %v791_v40, %v789_v38  ;;  %v804_v40 = vld [vmem:[#allocation5 + $0x1c0] sm:$0xff] }
 0x1e5   : > { %1246 = vmatprep.subr.bf16.mxu1 %v1245_v36  ;;  %v1323_v35 = vpack.c.bf16 %v786_v34, %v784_v31  ;;  %v854_v36 = vld [vmem:[#allocation5 + $0x348] sm:$0xff] }
 0x1e6   : > { %1312 = vmatpush1.bf16.msra.mxu0 %v1311_v47  ;;  %v1261_v39 = vpack.c.bf16 %v856_v37, %v854_v36  ;;  %v870_v31 = vld [vmem:[#allocation5 + $0x3c8] sm:$0xff]  ;;  %v869_v36 = vld [vmem:[#allocation5 + $0x3c0] sm:$0xff]  ;;  %v871_v37 = vld [vmem:[#allocation5 + $0x3d0] sm:$0xff] }
 0x1e7   : > { %1314 = vmatprep.subr.bf16.mxu0 %v1313_v52  ;;  %v795_v52 = vld [vmem:[#allocation5 + $0x178] sm:$0xff] }
 0x1e8   : > { %1248 = vmatpush1.bf16.msra.mxu1 %v1247_v46  ;;  %v790_v46 = vld [vmem:[#allocation5 + $0x150] sm:$0xff]  ;;  %v1329_v55 = vpack.c.bf16 %v795_v52, %v793_v50 }
 0x1e9   : > { %1250 = vmatprep.subr.bf16.mxu1 %v1249_v48  ;;  %v1327_v47 = vpack.c.bf16 %v790_v46, %v788_v45  ;;  %v858_v48 = vld [vmem:[#allocation5 + $0x368] sm:$0xff]  ;;  %v811_v46 = vld [vmem:[#allocation5 + $0x1f8] sm:$0xff]  ;;  %v875_v50 = vld [vmem:[#allocation5 + $0x3f0] sm:$0xff] }
 0x1ea   : > { %1316 = vmatpush1.bf16.msra.mxu0 %v1315_v59  ;;  %v1265_v51 = vpack.c.bf16 %v860_v49, %v858_v48  ;;  %v1820_v59 = vsub.s32 0, %v1802_v30  ;;  %v809_v45 = vld [vmem:[#allocation5 + $0x1e8] sm:$0xff]  ;;  %v873_v49 = vld [vmem:[#allocation5 + $0x3e0] sm:$0xff] }
 0x1eb   : > { %1318 = vmatprep.subr.bf16.mxu0 %v1317_v3  ;;  %v1269_v3 = vpack.c.bf16 %v864_v62, %v862_v61  ;;  %v1345_v48 = vpack.c.bf16 %v811_v46, %v809_v45  ;;  %v1283_v52 = vpack.c.bf16 %v875_v50, %v873_v49 }
 0x1ec   : > { %1252 = vmatpush1.bf16.msra.mxu1 %v1251_v58  ;;  %v794_v58 = vld [vmem:[#allocation5 + $0x170] sm:$0xff] }
 0x1ed   : > { %1254 = vmatprep.subr.bf16.mxu1 %v1253_v60  ;;  %v1331_v60 = vpack.c.bf16 %v794_v58, %v792_v57 }
 0x1ee   : > { %1320 = vmatpush1.bf16.msra.mxu0 %v1319_v15  ;;  %v796_v15 = vld [vmem:[#allocation5 + $0x180] sm:$0xff] }
 0x1ef   : > { %1322 = vmatprep.subr.bf16.mxu0 %v1321_v17 }
 0x1f0   : > { %1256 = vmatpush1.bf16.msra.mxu1 %v1255_v14  ;;  %v1271_v14 = vpack.c.bf16 %v863_v7, %v861_v6 }
 0x1f1   : > { %1258 = vmatprep.subr.bf16.mxu1 %v1257_v16  ;;  %v798_v16 = vld [vmem:[#allocation5 + $0x190] sm:$0xff] }
 0x1f2   : > { %1324 = vmatpush1.bf16.msra.mxu0 %v1323_v35  ;;  %v1335_v17 = vpack.c.bf16 %v798_v16, %v796_v15  ;;  %v807_v35 = vld [vmem:[#allocation5 + $0x1d8] sm:$0xff] }
 0x1f3   : > { %1326 = vmatprep.subr.bf16.mxu0 %v1325_v43  ;;  %v1343_v43 = vpack.c.bf16 %v806_v41, %v804_v40 }
 0x1f4   : > { %1260 = vmatpush1.bf16.msra.mxu1 %v1259_v33  ;;  %v805_v33 = vld [vmem:[#allocation5 + $0x1c8] sm:$0xff] }
 0x1f5   : > { %1262 = vmatprep.subr.bf16.mxu1 %v1261_v39  ;;  %v1341_v38 = vpack.c.bf16 %v807_v35, %v805_v33  ;;  %v1279_v39 = vpack.c.bf16 %v871_v37, %v869_v36 }
 0x1f6   : > { %1328 = vmatpush1.bf16.msra.mxu0 %v1327_v47 }
 0x1f7   : > { %1330 = vmatprep.subr.bf16.mxu0 %v1329_v55 }
 0x1f8   : > { %1264 = vmatpush1.bf16.msra.mxu1 %v1263_v44  ;;  %v876_v44 = vld [vmem:[#allocation5 + $0x3f8] sm:$0xff] }
 0x1f9   : > { %1266 = vmatprep.subr.bf16.mxu1 %v1265_v51  ;;  %v1281_v47 = vpack.c.bf16 %v876_v44, %v874_v42  ;;  %v808_v51 = vld [vmem:[#allocation5 + $0x1e0] sm:$0xff] }
 0x1fa   : > { %1332 = vmatpush1.bf16.msra.mxu0 %v1331_v60  ;;  %v1347_v54 = vpack.c.bf16 %v810_v53, %v808_v51 }
 0x1fb   : > { %1334 = vmatprep.subr.bf16.mxu0 %v1333_v11 }
 0x1fc   : > { %1268 = vmatpush1.bf16.msra.mxu1 %v1267_v56 }
 0x1fd   : > { %1270 = vmatprep.subr.bf16.mxu1 %v1269_v3 }
 0x1fe   : > { %1336 = vmatpush1.bf16.msra.mxu0 %v1335_v17 }
 0x200   : > { %1272 = vmatpush1.bf16.msra.mxu1 %v1271_v14 }
 0x2a0   : > { %v503_v20 = vpop.f32.mrb[2].mxu0 }
 0x2a1   : > { %v1350_v21 = vadd.f32 %v1349_v19, %v503_v20  ;;  %v1192_v22 = vpop.f32.mrb[3].mxu0  ;;  %v868_v19 = vld [vmem:[#allocation5 + $0x3b8] sm:$0xff]  ;;  %v801_v20 = vld [vmem:[#allocation5 + $0x1a8] sm:$0xff] }
 0x2a2   : > { %v672_v23 = vpop.f32.mrb[2].mxu1  ;;  %v803_v22 = vld [vmem:[#allocation5 + $0x1b8] sm:$0xff] }
 0x2a3   : > { %v1351_v24 = vadd.f32 %v1350_v21, %v672_v23  ;;  %v1208_v25 = vpop.f32.mrb[3].mxu1  ;;  %v1273_v21 = vpack.c.bf16 %v868_v19, %v866_v18  ;;  %v865_v23 = vld [vmem:[#allocation5 + $0x3a0] sm:$0xff] }
 0x2a4   : > { %v1337_v25 = vpack.c.bf16 %v803_v22, %v801_v20 }
 0x2a5   : > { %v1155_v26 = vmul.f32 -1.442695, %v1351_v24  ;;  %v867_v24 = vld [vmem:[#allocation5 + $0x3b0] sm:$0xff]  ;;  %1274 = vmatprep.subr.bf16.mxu1 %v1273_v21 }
 0x2a6   : > { %1338 = vmatprep.subr.bf16.mxu0 %v1337_v25 }
 0x2a7   : > { %1418 = vpow2.f32 %v1155_v26  ;;  %v1275_v26 = vpack.c.bf16 %v867_v24, %v865_v23 }
 0x2a9   : > { %1276 = vmatpush1.bf16.msra.mxu1 %v1275_v26 }
 0x2b1   : > { %v1419_v27 = vpop.eup %1418 }
 0x2b2   : > { %v680_v32 = vadd.f32 1.0, %v1419_v27  ;;  %v800_v27 = vld [vmem:[#allocation5 + $0x1a0] sm:$0xff] }
 0x2b3   : > { %v1339_v29 = vpack.c.bf16 %v802_v28, %v800_v27 }
 0x2b4   : > { %1420 = vrcp.f32 %v680_v32  ;;  %v872_v32 = vld [vmem:[#allocation5 + $0x3d8] sm:$0xff] }
 0x2b5   : > { %v1277_v34 = vpack.c.bf16 %v872_v32, %v870_v31  ;;  %1340 = vmatpush1.bf16.msra.mxu0 %v1339_v29 }
 0x2b6   : > { %1342 = vmatprep.subr.bf16.mxu0 %v1341_v38 }
 0x2b7   : > { %1278 = vmatprep.subr.bf16.mxu1 %v1277_v34 }
 0x2b8   : > { %1280 = vmatpush1.bf16.msra.mxu1 %v1279_v39 }
 0x2b9   : > { %1344 = vmatpush1.bf16.msra.mxu0 %v1343_v43  ;;  %1282 = vmatprep.subr.bf16.mxu1 %v1281_v47 }
 0x2ba   : > { %1346 = vmatprep.subr.bf16.mxu0 %v1345_v48 }
 0x2bc   : > { %1284 = vmatpush1.bf16.msra.mxu1 %v1283_v52 }
 0x2bd   : > { %1348 = vmatpush1.bf16.msra.mxu0 %v1347_v54 }
 0x2be   : > { %v1421_v10 = vpop.eup %1420 }
 0x2bf   : > { %v686_v30 = vrot.slane %v1421_v10, %v1820_v59 }
 0x2c1   : > { %692 = vbcast.lane.b32.xlu1 %v686_v30, 264  ;;  %688 = vbcast.lane.b32.xlu0 %v686_v30, 256 }
 0x2c5   : > { %696 = vbcast.lane.b32.xlu1 %v686_v30, 272 }
 0x2c9   : > { %700 = vbcast.lane.b32.xlu1 %v686_v30, 280 }
 0x333   : > { %v693_v55 = vpop.permute.xlu1 %692  ;;  %v689_v56 = vpop.permute.xlu0 %688 }
 0x334   : > { %v1824_v57 = vmul.f32 %v693_v55, %v1760_v2  ;;  %v1827_v58 = vmul.f32 %v693_v55, %v1766_v5  ;;  %v702_v60 = vmul.f32 %v689_v56, %v1756_v0  ;;  %v1831_v61 = vmul.f32 %v689_v56, %v1758_v1 }
 0x336   : > { %v728_v4 = vadd.f32 %v1824_v57, %v702_v60  ;;  %v737_v2 = vadd.f32 %v1827_v58, %v1831_v61 }
 0x337   : > { %v697_v62 = vpop.permute.xlu1 %696 }
 0x338   : > { %v706_v63 = vmul.f32 %v697_v62, %v1772_v8  ;;  %v1835_v3 = vmul.f32 %v697_v62, %v1774_v9 }
 0x33a   : > { %v729_v7 = vadd.f32 %v728_v4, %v706_v63  ;;  %v738_v5 = vadd.f32 %v737_v2, %v1835_v3  ;;  %v710_v10 = vmax.f32 %v702_v60, %v706_v63  ;;  %v719_v8 = vmax.f32 %v1831_v61, %v1835_v3 }
 0x33b   : > { %v701_v6 = vpop.permute.xlu1 %700 }
 0x33c   : > { %v708_v0 = vmul.f32 %v701_v6, %v1780_v12  ;;  %v709_v1 = vmul.f32 %v701_v6, %v1782_v13 }
 0x33e   : > { %v711_v9 = vmax.f32 %v1824_v57, %v708_v0  ;;  %v720_v11 = vmax.f32 %v1827_v58, %v709_v1  ;;  %v730_v14 = vadd.f32 %v729_v7, %v708_v0  ;;  %v739_v15 = vadd.f32 %v738_v5, %v709_v1 }
 0x340   : > { %v712_v16 = vmax.f32 %v710_v10, %v711_v9  ;;  %v721_v30 = vmax.f32 %v719_v8, %v720_v11  ;;  %v731_v17 = vrot.slane %v730_v14, 4  ;;  %v740_v18 = vrot.slane %v739_v15, 4 }
 0x342   : > { %v713_v19 = vrot.slane %v712_v16, 4  ;;  %v722_v20 = vrot.slane %v721_v30, 4  ;;  %v732_v21 = vadd.f32 %v731_v17, %v730_v14  ;;  %v741_v12 = vadd.f32 %v740_v18, %v739_v15 }
 0x344   : > { %v714_v22 = vmax.f32 %v712_v16, %v713_v19  ;;  %v733_v13 = vrot.slane %v732_v21, 2  ;;  %v742_v23 = vrot.slane %v741_v12, 2  ;;  %v723_v24 = vmax.f32 %v721_v30, %v722_v20 }
 0x346   : > { %v715_v25 = vrot.slane %v714_v22, 2  ;;  %v734_v26 = vadd.f32 %v733_v13, %v732_v21  ;;  %v743_v27 = vadd.f32 %v742_v23, %v741_v12  ;;  %v724_v28 = vrot.slane %v723_v24, 2 }
 0x348   : > { %v744_v29 = vrot.slane %v743_v27, 1  ;;  %v725_v31 = vmax.f32 %v723_v24, %v724_v28  ;;  %v735_v32 = vrot.slane %v734_v26, 1  ;;  %v716_v33 = vmax.f32 %v714_v22, %v715_v25 }
 0x34a   : > { %v745_v34 = vadd.f32 %v744_v29, %v743_v27  ;;  %v726_v35 = vrot.slane %v725_v31, 1  ;;  %v736_v36 = vadd.f32 %v735_v32, %v734_v26  ;;  %v717_v37 = vrot.slane %v716_v33, 1 }
 0x34c   : > { %v747_v38 = vmul.f32 0.03125, %v745_v34  ;;  %v727_v39 = vmax.f32 %v725_v31, %v726_v35  ;;  %v746_v40 = vmul.f32 0.03125, %v736_v36  ;;  %v718_v41 = vmax.f32 %v716_v33, %v717_v37 }
 0x34e   : > { %941 = vmatprep.mubr.f32.mxu1 %v747_v38  ;;  %1012 = vmatprep.mubr.f32.mxu0 %v727_v39 }
 0x34f   : > { %942 = vmatmul.mubr.f32.vlgmr.msra.gmra.mrb[4].mxu1 %v746_v40  ;;  %1013 = vmatmul.mubr.f32.vlgmr.msra.gmra.mrb[4].mxu0 %v718_v41 }
 0x422   : > { %v943_v42 = vpop.f32.mrb[4].mxu1  ;;  %v1014_v43 = vpop.f32.mrb[4].mxu0 }
 0x423   : > { %v1015_v44 = vadd.f32 %v1014_v43, %v943_v42  ;;  %v945_v45 = vpop.f32.mrb[5].mxu1  ;;  %v1016_v46 = vpop.f32.mrb[5].mxu0 }
 0x424   : > { %v1017_v47 = vadd.f32 %v1016_v46, %v945_v45 }
 0x425   : > { %v1022_v48 = vrot.slane %v1015_v44, %v1820_v59 }
 0x426   : > { %v1026_v49 = vrot.slane %v1017_v47, %v1820_v59 }
 0x427   : > { %v1027_v50 = vmul.f32 %v1022_v48, %v702_v60  ;;  %v1029_v51 = vmul.f32 %v1022_v48, %v1824_v57  ;;  %v1031_v52 = vmul.f32 %v1022_v48, %v706_v63  ;;  %v1033_v53 = vmul.f32 %v1022_v48, %v708_v0 }
 0x428   : > { %v1028_v54 = vmul.f32 %v1026_v49, %v1831_v61  ;;  %v1030_v59 = vmul.f32 %v1026_v49, %v1827_v58  ;;  %v1032_v55 = vmul.f32 %v1026_v49, %v1835_v3  ;;  %v1034_v56 = vmul.f32 %v1026_v49, %v709_v1 }
 0x429   : > { %1035 = vst [vmem:[%s284_s20] sm:$0xff] %v1027_v50  ;;  %1037 = vst [vmem:[%s284_s20 + $0x10] sm:$0xff] %v1029_v51 }
 0x42a   : > { %1039 = vst [vmem:[%s284_s20 + $0x20] sm:$0xff] %v1031_v52  ;;  %1041 = vst [vmem:[%s284_s20 + $0x30] sm:$0xff] %v1033_v53 }
 0x42b   : > { %1036 = vst [vmem:[%s284_s20 + $0x8] sm:$0xff] %v1028_v54  ;;  %1038 = vst [vmem:[%s284_s20 + $0x18] sm:$0xff] %v1030_v59 }
 0x42c   : > { %1040 = vst [vmem:[%s284_s20 + $0x28] sm:$0xff] %v1032_v55  ;;  %1042 = vst [vmem:[%s284_s20 + $0x38] sm:$0xff] %v1034_v56 }
 0x42d   : > { %1493 = shalt.err (!%p1490_p7)
}
 0x42e   : > { %s1494_s18 = scalar_lea.hbm %s1856_s30, 1024  ;;  %s1498_s27 = scalar_lea.hbm %s1911_s6, 2048 }
 0x42f   : > { %p1495_p9 = scmp.ne.s32.totalorder %s1856_s30, %s1494_s18  ;;  %p1499_p5 = scmp.lt.u32.totalorder %s1856_s30, %s1911_s6 }
 0x430   : > { %p1500_p11 = scmp.lt.u32.totalorder %s1498_s27, %s1494_s18  ;;  %p1502_p4 = scmp.lt.u32.totalorder %s1494_s18, %s1856_s30 }
 0x431   : > { %p1496_p1 = pnand %p1495_p9, %p1691_p12 }
 0x432   : > { %p1501_p2 = por %p1500_p11, %p1499_p5 }
 0x433   : > { %p1497_p0 = pneg %p1496_p1 }
 0x434   : > { %p1503_p6 = por %p1502_p4, %p1501_p2 }
 0x436   : > { %p1504_p8 = pnand %p1503_p6, %p1497_p0 }
 0x438   : > { %1507 = shalt.err (!%p1504_p8)
}
 0x439   : > { %s1560_s19 = smov 256   ;;  %s1561_s10 = smov 16  }
 0x43a   : > { %1360 = dma.vmem_to_hbm [thread:$0]  (%p1691_p12), %s1858_s26, 1024, %s1856_s30, %s1044_s25, %s1560_s19, %s1560_s19, %s1561_s10  }
 0x43b PF: > { %s1072_s17 = sand.u32 1, %s1538_s21   ;;  %p1926_p10 = scmp.ne.s32.totalorder %s1916_s28, 0 }
 0x43c   : > { %p1927_p13 = scmp.ge.s32.totalorder %s1550_s24, 2  ;;  %s1073_s8 = scalar_lea.sflag [#allocation4], %s1072_s17 }
 0x43e   : > { %p1371_p3 = pnand %p1927_p13, %p1926_p10 }
 0x440   : > { %1533 = dma.done.wait (!%p1371_p3), %s1073_s8, 1024  }
 0x441   : > { %1535 = vsyncadd (!%p1371_p3), %s1073_s8, 4294966272  ;;  %p20_p7 = scmp.ge.s32.totalorder %s1653_s9, 4   ;;  %s1928_s21 = smov %s1542_s22 }
 0x442   : > { %s1929_s22 = smov %s1546_s23  ;;  %s1930_s23 = smov %s1687_s13 }
 0x443   : > { %s1931_s24 = smov %s1653_s9  ;;  %22 = sbr.rel (!%p20_p7) target bundleno = 6 (0x6), region = 94 }
 0x44a   :  { %1078 = vsyncpa [#allocation3], 1 }
 0x44b   :  { %1080 = vsyncpa [#allocation3 + $0x1], 1 }
 0x44c   :  { %1081 = vsyncpa [#allocation6], 1 }
 0x44d   :  { %1082 = vsyncpa [#allocation4], 1 }
 0x44e   :  { %1084 = vsyncpa [#allocation4 + $0x1], 1 }

</bundles_post_ra>
